<compile_context>
chip_gen: v7x
topology: tpu7x:2x2x1
jax: 0.10.0
libtpu: 0.0.40
codegen_flags: <defaults>
</compile_context>

<pallas_src>
import functools

import jax
import jax.numpy as jnp
from jax.experimental import pallas as pl
from jax.experimental.pallas import tpu as pltpu


_LANES = 512          # lane-dense row width (multiple of 128)
_MAX_TILE_ROWS = 256  # rows per grid step: 8 arrays x 2 bufs x 256x512x4B ~= 8 MiB


def _round_up(x, m):
    return ((x + m - 1) // m) * m


# --------------------------------------------------------------------------
# Kernel 1: elementwise BCE + all masked reductions (tiled, accumulator)
# --------------------------------------------------------------------------
def _reduce_kernel(bin_ref, gt_ref, mask_ref, tpred_ref, tmap_ref, tmask_ref,
                   tbin_ref, negmap_ref, sums_ref, acc_ref):
    i = pl.program_id(0)

    @pl.when(i == 0)
    def _():
        acc_ref[...] = jnp.zeros_like(acc_ref)

    # Cast after load (inputs may arrive as bf16/uint8; compute in f32).
    pred = bin_ref[...].astype(jnp.float32)
    gt = gt_ref[...].astype(jnp.float32)
    mask = mask_ref[...].astype(jnp.float32)

    pos = gt * mask               # (gt * mask).byte()     -- gt, mask in {0,1}
    neg = mask - pos              # ((1 - gt) * mask).byte()

    # Single-log BCE (exact because gt is strictly 0/1); torch clamps log@-100.
    p_sel = jnp.where(gt > 0.5, pred, 1.0 - pred)
    bce = -jnp.maximum(jnp.log(p_sel), -100.0)

    negmap_ref[...] = bce * neg   # negative loss map (for top-k)

    tb = tbin_ref[...].astype(jnp.float32)
    tm = tmask_ref[...].astype(jnp.float32)
    tdiff = jnp.abs(tpred_ref[...].astype(jnp.float32)
                    - tmap_ref[...].astype(jnp.float32))

    def col(x):  # per-lane partials: sublane-reduce per tile, VPU adds across
        return jnp.sum(x, axis=0, keepdims=True)

    acc_ref[0:1, :] += col(bce * pos)    # positive BCE sum
    acc_ref[1:2, :] += col(pos)          # positive count
    acc_ref[2:3, :] += col(neg)          # negative count
    acc_ref[3:4, :] += col(tb * pos)     # dice intersection  (tb*gt*mask)
    acc_ref[4:5, :] += col(tb * mask)    # dice (pred*mask).sum
    acc_ref[5:6, :] += col(pos)          # dice (gt*mask).sum
    acc_ref[6:7, :] += col(tdiff * tm)   # masked-L1 numerator
    acc_ref[7:8, :] += col(tm)           # masked-L1 denominator

    @pl.when(i == pl.num_programs(0) - 1)
    def _():
        sums_ref[...] = jnp.sum(acc_ref[...], axis=1, keepdims=True)  # (8,1)


# --------------------------------------------------------------------------
# Kernel 2: dynamic top-k masked sum (tiled) + final loss combination
# --------------------------------------------------------------------------
def _combine_kernel(sums_ref, sorted_ref,
                    loss_ref, bce_ref, dice_ref, l1_ref, acc_ref,
                    *, l1_scale, bce_scale, eps, negative_ratio, bce_eps,
                    tile_rows, width):
    i = pl.program_id(0)

    @pl.when(i == 0)
    def _():
        acc_ref[...] = jnp.zeros_like(acc_ref)

    pos_cnt = sums_ref[1:2, 0:1]
    neg_cnt = sums_ref[2:3, 0:1]

    # negative_count = min(int(#neg), int(negative_ratio * #pos))  (floored)
    k_i = jnp.minimum(neg_cnt,
                      jnp.floor(negative_ratio * pos_cnt)).astype(jnp.int32)

    s = sorted_ref[...]                         # descending-sorted tile
    r, c = s.shape
    base = i * (tile_rows * width)              # int32 global flat offset
    row = jax.lax.broadcasted_iota(jnp.int32, (r, c), 0)
    colm = jax.lax.broadcasted_iota(jnp.int32, (r, c), 1)
    flat = base + row * c + colm
    acc_ref[...] += jnp.sum(jnp.where(flat < k_i, s, 0.0), keepdims=True)

    @pl.when(i == pl.num_programs(0) - 1)
    def _():
        pos_sum = sums_ref[0:1, 0:1]
        di = sums_ref[3:4, 0:1]
        dpm = sums_ref[4:5, 0:1]
        dgm = sums_ref[5:6, 0:1]
        l1n = sums_ref[6:7, 0:1]
        l1d = sums_ref[7:8, 0:1]

        kf = k_i.astype(jnp.float32)
        bce = (pos_sum + acc_ref[...]) / (pos_cnt + kf + bce_eps)
        dice = 1.0 - 2.0 * di / (dpm + dgm + eps)
        l1 = jnp.where(l1d == 0.0, 0.0, l1n / l1d)
        loss = dice + l1_scale * l1 + bce_scale * bce

        loss_ref[...] = loss
        bce_ref[...] = bce
        dice_ref[...] = dice
        l1_ref[...] = l1


# --------------------------------------------------------------------------
# Wrapper: mirrors DBLoss.forward
# --------------------------------------------------------------------------
def db_loss(pred_batch, gt_batch, *, l1_scale=10.0, bce_scale=1.0, eps=1e-6,
            negative_ratio=3.0, bce_eps=1e-6):
    binary = pred_batch['binary'][:, 0]
    gt = gt_batch['gt']
    mask = gt_batch['mask']
    has_thresh = 'thresh' in pred_batch
    if has_thresh:
        thresh = pred_batch['thresh'][:, 0]
        thresh_binary = pred_batch['thresh_binary'][:, 0]
        thresh_map = gt_batch['thresh_map']
        thresh_mask = gt_batch['thresh_mask']
    else:
        thresh = jnp.zeros_like(gt)
        thresh_binary = jnp.zeros_like(gt)
        thresh_map = jnp.zeros_like(gt)
        thresh_mask = jnp.zeros_like(gt)

    total = int(gt.size)
    rows = (total + _LANES - 1) // _LANES
    tile = min(_MAX_TILE_ROWS, _round_up(rows, 8))
    rows_padded = _round_up(rows, tile)
    total_padded = rows_padded * _LANES
    grid = (rows_padded // tile,)

    def flat(x):
        # No dtype up-cast here: the kernels cast after load.  Zero padding is
        # exact because every reduction term is weighted by a padded-zero mask.
        f = x.reshape(-1)
        if total_padded > total:
            f = jnp.pad(f, (0, total_padded - total))
        return f.reshape(rows_padded, _LANES)

    args = [flat(binary), flat(gt), flat(mask), flat(thresh),
            flat(thresh_map), flat(thresh_mask), flat(thresh_binary)]

    tile_spec = pl.BlockSpec((tile, _LANES), lambda i: (i, 0))
    sums_spec = pl.BlockSpec((8, 1), lambda i: (0, 0))
    scalar_spec = pl.BlockSpec((1, 1), lambda i: (0, 0))

    cparams = pltpu.CompilerParams(
        dimension_semantics=("arbitrary",),
        vmem_limit_bytes=32 * 1024 * 1024)

    negmap, sums = pl.pallas_call(
        _reduce_kernel,
        grid=grid,
        in_specs=[tile_spec] * 7,
        out_specs=[tile_spec, sums_spec],
        out_shape=[jax.ShapeDtypeStruct((rows_padded, _LANES), jnp.float32),
                   jax.ShapeDtypeStruct((8, 1), jnp.float32)],
        scratch_shapes=[pltpu.VMEM((8, _LANES), jnp.float32)],
        compiler_params=cparams,
        cost_estimate=pl.CostEstimate(
            flops=20 * total_padded,
            transcendentals=total_padded,
            bytes_accessed=8 * total_padded * 4),
    )(*args)

    # TODO(synk): torch.topk's global sort stays in XLA glue; an in-kernel
    # histogram/threshold selection over bce*neg would remove this O(n log n)
    # pass (dominant at production sizes) but needs exact tie handling.
    sorted_neg = (-jnp.sort(-negmap.reshape(-1))).reshape(rows_padded, _LANES)

    kern = functools.partial(
        _combine_kernel, l1_scale=float(l1_scale), bce_scale=float(bce_scale),
        eps=float(eps), negative_ratio=float(negative_ratio),
        bce_eps=float(bce_eps), tile_rows=tile, width=_LANES)

    loss, bce, dice, l1 = pl.pallas_call(
        kern,
        grid=grid,
        in_specs=[sums_spec, tile_spec],
        out_specs=[scalar_spec] * 4,
        out_shape=[jax.ShapeDtypeStruct((1, 1), jnp.float32)] * 4,
        scratch_shapes=[pltpu.VMEM((1, 1), jnp.float32)],
        compiler_params=cparams,
        cost_estimate=pl.CostEstimate(
            flops=4 * total_padded,
            transcendentals=0,
            bytes_accessed=total_padded * 4),
    )(sums, sorted_neg)

    if has_thresh:
        metrics = dict(loss_bce=bce[0, 0], loss_thresh=dice[0, 0],
                       l1_loss=l1[0, 0])
        return loss[0, 0], metrics
    return bce[0, 0], dict(loss_bce=bce[0, 0])


# --------------------------------------------------------------------------
# Pure-JAX reference (mirrors the PyTorch semantics) for validation
# --------------------------------------------------------------------------
def db_loss_ref(pred_batch, gt_batch, l1_scale=10.0, bce_scale=1.0, eps=1e-6,
                negative_ratio=3.0, bce_eps=1e-6):
    pred = pred_batch['binary'][:, 0]
    gt = gt_batch['gt']
    mask = gt_batch['mask']
    pos = gt * mask
    neg = (1.0 - gt) * mask
    pos_cnt = pos.sum()
    k = jnp.minimum(jnp.floor(neg.sum()),
                    jnp.floor(negative_ratio * pos_cnt))   # int() in torch
    bce_map = -(gt * jnp.maximum(jnp.log(pred), -100.0)
                + (1.0 - gt) * jnp.maximum(jnp.log(1.0 - pred), -100.0))
    pos_loss = (bce_map * pos).sum()
    neg_sorted = -jnp.sort(-(bce_map * neg).reshape(-1))
    idx = jnp.arange(neg_sorted.shape[0], dtype=jnp.int32)
    neg_loss = jnp.where(idx < k.astype(jnp.int32), neg_sorted, 0.0).sum()
    bce = (pos_loss + neg_loss) / (pos_cnt + k + bce_eps)

    tb = pred_batch['thresh_binary'][:, 0]
    inter = (tb * gt * mask).sum()
    union = (tb * mask).sum() + (gt * mask).sum() + eps
    dice = 1.0 - 2.0 * inter / union

    tp = pred_batch['thresh'][:, 0]
    tm = gt_batch['thresh_mask']
    msum = tm.sum()
    l1 = jnp.where(msum == 0.0, 0.0,
                   (jnp.abs(tp - gt_batch['thresh_map']) * tm).sum() / msum)
    return dice + l1_scale * l1 + bce_scale * bce


if __name__ == "__main__":
    key = jax.random.PRNGKey(0)
    k1, k2, k3, k4, k5, k6, k7 = jax.random.split(key, 7)

    N, H, W = 2, 16, 16
    pred_batch = dict(
        binary=jax.nn.sigmoid(jax.random.normal(k1, (N, 1, H, W), jnp.float32)),
        thresh=jax.nn.sigmoid(jax.random.normal(k2, (N, 1, H, W), jnp.float32)),
        thresh_binary=jax.nn.sigmoid(
            jax.random.normal(k3, (N, 1, H, W), jnp.float32)),
    )
    gt_batch = dict(
        gt=(jax.random.uniform(k4, (N, H, W)) > 0.5).astype(jnp.float32),
        mask=(jax.random.uniform(k5, (N, H, W)) > 0.3).astype(jnp.float32),
        thresh_map=jax.random.uniform(k6, (N, H, W), jnp.float32),
        thresh_mask=(jax.random.uniform(k7, (N, H, W)) > 0.5).astype(jnp.float32),
    )

    loss, metrics = db_loss(pred_batch, gt_batch)
    loss = jax.block_until_ready(loss)
    for v in metrics.values():
        jax.block_until_ready(v)

    ref = db_loss_ref(pred_batch, gt_batch)
    assert jnp.isfinite(loss), "non-finite loss"
    assert jnp.allclose(loss, ref, rtol=1e-4, atol=1e-5), (loss, ref)

    print("KERNEL_OK")
</pallas_src>

<mosaic_0001>
module attributes {stable_mosaic.version = 11 : i64} {
  func.func @_reduce_kernel(%arg0: i32, %arg1: memref<8x512xf32, #tpu.memory_space<vmem>>, %arg2: memref<8x512xf32, #tpu.memory_space<vmem>>, %arg3: memref<8x512xf32, #tpu.memory_space<vmem>>, %arg4: memref<8x512xf32, #tpu.memory_space<vmem>>, %arg5: memref<8x512xf32, #tpu.memory_space<vmem>>, %arg6: memref<8x512xf32, #tpu.memory_space<vmem>>, %arg7: memref<8x512xf32, #tpu.memory_space<vmem>>, %arg8: memref<8x512xf32, #tpu.memory_space<vmem>>, %arg9: memref<8x1xf32, #tpu.memory_space<vmem>>, %arg10: memref<8x512xf32, #tpu.memory_space<vmem>>) attributes {dimension_semantics = [#tpu.dimension_semantics<arbitrary>], iteration_bounds = array<i64: 1>, scalar_prefetch = 0 : i64, scratch_operands = 1 : i64, tpu.core_type = #tpu.core_type<tc>, window_params = [{transform_indices = @transform_0, window_bounds = array<i64: 8, 512>}, {transform_indices = @transform_1, window_bounds = array<i64: 8, 512>}, {transform_indices = @transform_2, window_bounds = array<i64: 8, 512>}, {transform_indices = @transform_3, window_bounds = array<i64: 8, 512>}, {transform_indices = @transform_4, window_bounds = array<i64: 8, 512>}, {transform_indices = @transform_5, window_bounds = array<i64: 8, 512>}, {transform_indices = @transform_6, window_bounds = array<i64: 8, 512>}, {transform_indices = @transform_7, window_bounds = array<i64: 8, 512>}, {pipeline_mode = #tpu.pipeline_mode<synchronous>, transform_indices = @transform_8, window_bounds = array<i64: 8, 1>}]} {
    %c0_i32 = arith.constant 0 : i32
    %0 = arith.cmpi eq, %arg0, %c0_i32 : i32
    %1 = arith.extui %0 : i1 to i32
    %c0_i32_0 = arith.constant 0 : i32
    %2 = arith.cmpi ne, %1, %c0_i32_0 : i32
    scf.if %2 {
      %cst_54 = arith.constant 0.000000e+00 : f32
      %73 = vector.broadcast %cst_54 : f32 to vector<8x512xf32>
      %c0_55 = arith.constant 0 : index
      %c0_56 = arith.constant 0 : index
      %74 = vector.load %arg10[%c0_55, %c0_56] : memref<8x512xf32, #tpu.memory_space<vmem>>, vector<8x512xf32>
      tpu.vector_store %arg10[%c0_55, %c0_56], %73 {strides = array<i32>} : memref<8x512xf32, #tpu.memory_space<vmem>>, vector<8x512xf32>,
    } else {
    }
    %c0 = arith.constant 0 : index
    %c0_1 = arith.constant 0 : index
    %3 = vector.load %arg1[%c0, %c0_1] : memref<8x512xf32, #tpu.memory_space<vmem>>, vector<8x512xf32>
    %c0_2 = arith.constant 0 : index
    %c0_3 = arith.constant 0 : index
    %4 = vector.load %arg2[%c0_2, %c0_3] : memref<8x512xf32, #tpu.memory_space<vmem>>, vector<8x512xf32>
    %c0_4 = arith.constant 0 : index
    %c0_5 = arith.constant 0 : index
    %5 = vector.load %arg3[%c0_4, %c0_5] : memref<8x512xf32, #tpu.memory_space<vmem>>, vector<8x512xf32>
    %6 = arith.mulf %4, %5 : vector<8x512xf32>
    %7 = arith.subf %5, %6 : vector<8x512xf32>
    %cst = arith.constant 5.000000e-01 : f32
    %8 = vector.broadcast %cst : f32 to vector<8x512xf32>
    %9 = arith.cmpf ogt, %4, %8 : vector<8x512xf32>
    %cst_6 = arith.constant 1.000000e+00 : f32
    %10 = vector.broadcast %cst_6 : f32 to vector<8x512xf32>
    %11 = arith.subf %10, %3 : vector<8x512xf32>
    %12 = arith.select %9, %3, %11 : vector<8x512xi1>, vector<8x512xf32>
    %13 = math.log %12 : vector<8x512xf32>
    %cst_7 = arith.constant -1.000000e+02 : f32
    %14 = vector.broadcast %cst_7 : f32 to vector<8x512xf32>
    %15 = arith.maximumf %13, %14 : vector<8x512xf32>
    %cst_8 = arith.constant 0.000000e+00 : f32
    %16 = vector.broadcast %cst_8 : f32 to vector<8x512xf32>
    %17 = arith.subf %16, %15 : vector<8x512xf32>
    %18 = arith.mulf %17, %7 : vector<8x512xf32>
    %c0_9 = arith.constant 0 : index
    %c0_10 = arith.constant 0 : index
    %19 = vector.load %arg8[%c0_9, %c0_10] : memref<8x512xf32, #tpu.memory_space<vmem>>, vector<8x512xf32>
    tpu.vector_store %arg8[%c0_9, %c0_10], %18 {strides = array<i32>} : memref<8x512xf32, #tpu.memory_space<vmem>>, vector<8x512xf32>,
    %c0_11 = arith.constant 0 : index
    %c0_12 = arith.constant 0 : index
    %20 = vector.load %arg7[%c0_11, %c0_12] : memref<8x512xf32, #tpu.memory_space<vmem>>, vector<8x512xf32>
    %c0_13 = arith.constant 0 : index
    %c0_14 = arith.constant 0 : index
    %21 = vector.load %arg6[%c0_13, %c0_14] : memref<8x512xf32, #tpu.memory_space<vmem>>, vector<8x512xf32>
    %c0_15 = arith.constant 0 : index
    %c0_16 = arith.constant 0 : index
    %22 = vector.load %arg4[%c0_15, %c0_16] : memref<8x512xf32, #tpu.memory_space<vmem>>, vector<8x512xf32>
    %c0_17 = arith.constant 0 : index
    %c0_18 = arith.constant 0 : index
    %23 = vector.load %arg5[%c0_17, %c0_18] : memref<8x512xf32, #tpu.memory_space<vmem>>, vector<8x512xf32>
    %24 = arith.subf %22, %23 : vector<8x512xf32>
    %25 = math.absf %24 : vector<8x512xf32>
    %c0_19 = arith.constant 0 : index
    %c0_20 = arith.constant 0 : index
    %26 = vector.load %arg10[%c0_19, %c0_20] : memref<8x512xf32, #tpu.memory_space<vmem>>, vector<1x512xf32>
    %27 = arith.mulf %17, %6 : vector<8x512xf32>
    %cst_21 = arith.constant dense<0.000000e+00> : vector<512xf32>
    %28 = vector.multi_reduction <add>, %27, %cst_21 [0] : vector<8x512xf32> to vector<512xf32>
    %29 = vector.shape_cast %28 : vector<512xf32> to vector<1x512xf32>
    %30 = arith.addf %26, %29 : vector<1x512xf32>
    %c0_22 = arith.constant 0 : index
    %c0_23 = arith.constant 0 : index
    %31 = vector.load %arg10[%c0_22, %c0_23] : memref<8x512xf32, #tpu.memory_space<vmem>>, vector<1x512xf32>
    tpu.vector_store %arg10[%c0_22, %c0_23], %30 {strides = array<i32>} : memref<8x512xf32, #tpu.memory_space<vmem>>, vector<1x512xf32>,
    %c1 = arith.constant 1 : index
    %c0_24 = arith.constant 0 : index
    %32 = vector.load %arg10[%c1, %c0_24] : memref<8x512xf32, #tpu.memory_space<vmem>>, vector<1x512xf32>
    %cst_25 = arith.constant dense<0.000000e+00> : vector<512xf32>
    %33 = vector.multi_reduction <add>, %6, %cst_25 [0] : vector<8x512xf32> to vector<512xf32>
    %34 = vector.shape_cast %33 : vector<512xf32> to vector<1x512xf32>
    %35 = arith.addf %32, %34 : vector<1x512xf32>
    %c1_26 = arith.constant 1 : index
    %c0_27 = arith.constant 0 : index
    %36 = vector.load %arg10[%c1_26, %c0_27] : memref<8x512xf32, #tpu.memory_space<vmem>>, vector<1x512xf32>
    tpu.vector_store %arg10[%c1_26, %c0_27], %35 {strides = array<i32>} : memref<8x512xf32, #tpu.memory_space<vmem>>, vector<1x512xf32>,
    %c2 = arith.constant 2 : index
    %c0_28 = arith.constant 0 : index
    %37 = vector.load %arg10[%c2, %c0_28] : memref<8x512xf32, #tpu.memory_space<vmem>>, vector<1x512xf32>
    %cst_29 = arith.constant dense<0.000000e+00> : vector<512xf32>
    %38 = vector.multi_reduction <add>, %7, %cst_29 [0] : vector<8x512xf32> to vector<512xf32>
    %39 = vector.shape_cast %38 : vector<512xf32> to vector<1x512xf32>
    %40 = arith.addf %37, %39 : vector<1x512xf32>
    %c2_30 = arith.constant 2 : index
    %c0_31 = arith.constant 0 : index
    %41 = vector.load %arg10[%c2_30, %c0_31] : memref<8x512xf32, #tpu.memory_space<vmem>>, vector<1x512xf32>
    tpu.vector_store %arg10[%c2_30, %c0_31], %40 {strides = array<i32>} : memref<8x512xf32, #tpu.memory_space<vmem>>, vector<1x512xf32>,
    %c3 = arith.constant 3 : index
    %c0_32 = arith.constant 0 : index
    %42 = vector.load %arg10[%c3, %c0_32] : memref<8x512xf32, #tpu.memory_space<vmem>>, vector<1x512xf32>
    %43 = arith.mulf %20, %6 : vector<8x512xf32>
    %cst_33 = arith.constant dense<0.000000e+00> : vector<512xf32>
    %44 = vector.multi_reduction <add>, %43, %cst_33 [0] : vector<8x512xf32> to vector<512xf32>
    %45 = vector.shape_cast %44 : vector<512xf32> to vector<1x512xf32>
    %46 = arith.addf %42, %45 : vector<1x512xf32>
    %c3_34 = arith.constant 3 : index
    %c0_35 = arith.constant 0 : index
    %47 = vector.load %arg10[%c3_34, %c0_35] : memref<8x512xf32, #tpu.memory_space<vmem>>, vector<1x512xf32>
    tpu.vector_store %arg10[%c3_34, %c0_35], %46 {strides = array<i32>} : memref<8x512xf32, #tpu.memory_space<vmem>>, vector<1x512xf32>,
    %c4 = arith.constant 4 : index
    %c0_36 = arith.constant 0 : index
    %48 = vector.load %arg10[%c4, %c0_36] : memref<8x512xf32, #tpu.memory_space<vmem>>, vector<1x512xf32>
    %49 = arith.mulf %20, %5 : vector<8x512xf32>
    %cst_37 = arith.constant dense<0.000000e+00> : vector<512xf32>
    %50 = vector.multi_reduction <add>, %49, %cst_37 [0] : vector<8x512xf32> to vector<512xf32>
    %51 = vector.shape_cast %50 : vector<512xf32> to vector<1x512xf32>
    %52 = arith.addf %48, %51 : vector<1x512xf32>
    %c4_38 = arith.constant 4 : index
    %c0_39 = arith.constant 0 : index
    %53 = vector.load %arg10[%c4_38, %c0_39] : memref<8x512xf32, #tpu.memory_space<vmem>>, vector<1x512xf32>
    tpu.vector_store %arg10[%c4_38, %c0_39], %52 {strides = array<i32>} : memref<8x512xf32, #tpu.memory_space<vmem>>, vector<1x512xf32>,
    %c5 = arith.constant 5 : index
    %c0_40 = arith.constant 0 : index
    %54 = vector.load %arg10[%c5, %c0_40] : memref<8x512xf32, #tpu.memory_space<vmem>>, vector<1x512xf32>
    %cst_41 = arith.constant dense<0.000000e+00> : vector<512xf32>
    %55 = vector.multi_reduction <add>, %6, %cst_41 [0] : vector<8x512xf32> to vector<512xf32>
    %56 = vector.shape_cast %55 : vector<512xf32> to vector<1x512xf32>
    %57 = arith.addf %54, %56 : vector<1x512xf32>
    %c5_42 = arith.constant 5 : index
    %c0_43 = arith.constant 0 : index
    %58 = vector.load %arg10[%c5_42, %c0_43] : memref<8x512xf32, #tpu.memory_space<vmem>>, vector<1x512xf32>
    tpu.vector_store %arg10[%c5_42, %c0_43], %57 {strides = array<i32>} : memref<8x512xf32, #tpu.memory_space<vmem>>, vector<1x512xf32>,
    %c6 = arith.constant 6 : index
    %c0_44 = arith.constant 0 : index
    %59 = vector.load %arg10[%c6, %c0_44] : memref<8x512xf32, #tpu.memory_space<vmem>>, vector<1x512xf32>
    %60 = arith.mulf %25, %21 : vector<8x512xf32>
    %cst_45 = arith.constant dense<0.000000e+00> : vector<512xf32>
    %61 = vector.multi_reduction <add>, %60, %cst_45 [0] : vector<8x512xf32> to vector<512xf32>
    %62 = vector.shape_cast %61 : vector<512xf32> to vector<1x512xf32>
    %63 = arith.addf %59, %62 : vector<1x512xf32>
    %c6_46 = arith.constant 6 : index
    %c0_47 = arith.constant 0 : index
    %64 = vector.load %arg10[%c6_46, %c0_47] : memref<8x512xf32, #tpu.memory_space<vmem>>, vector<1x512xf32>
    tpu.vector_store %arg10[%c6_46, %c0_47], %63 {strides = array<i32>} : memref<8x512xf32, #tpu.memory_space<vmem>>, vector<1x512xf32>,
    %c7 = arith.constant 7 : index
    %c0_48 = arith.constant 0 : index
    %65 = vector.load %arg10[%c7, %c0_48] : memref<8x512xf32, #tpu.memory_space<vmem>>, vector<1x512xf32>
    %cst_49 = arith.constant dense<0.000000e+00> : vector<512xf32>
    %66 = vector.multi_reduction <add>, %21, %cst_49 [0] : vector<8x512xf32> to vector<512xf32>
    %67 = vector.shape_cast %66 : vector<512xf32> to vector<1x512xf32>
    %68 = arith.addf %65, %67 : vector<1x512xf32>
    %c7_50 = arith.constant 7 : index
    %c0_51 = arith.constant 0 : index
    %69 = vector.load %arg10[%c7_50, %c0_51] : memref<8x512xf32, #tpu.memory_space<vmem>>, vector<1x512xf32>
    tpu.vector_store %arg10[%c7_50, %c0_51], %68 {strides = array<i32>} : memref<8x512xf32, #tpu.memory_space<vmem>>, vector<1x512xf32>,
    %c0_i32_52 = arith.constant 0 : i32
    %70 = arith.cmpi eq, %arg0, %c0_i32_52 : i32
    %71 = arith.extui %70 : i1 to i32
    %c0_i32_53 = arith.constant 0 : i32
    %72 = arith.cmpi ne, %71, %c0_i32_53 : i32
    scf.if %72 {
      %c0_54 = arith.constant 0 : index
      %c0_55 = arith.constant 0 : index
      %73 = vector.load %arg10[%c0_54, %c0_55] : memref<8x512xf32, #tpu.memory_space<vmem>>, vector<8x512xf32>
      %cst_56 = arith.constant dense<0.000000e+00> : vector<8xf32>
      %74 = vector.multi_reduction <add>, %73, %cst_56 [1] : vector<8x512xf32> to vector<8xf32>
      %75 = vector.shape_cast %74 : vector<8xf32> to vector<8x1xf32>
      %c0_57 = arith.constant 0 : index
      %c0_58 = arith.constant 0 : index
      %76 = vector.load %arg9[%c0_57, %c0_58] : memref<8x1xf32, #tpu.memory_space<vmem>>, vector<8x1xf32>
      tpu.vector_store %arg9[%c0_57, %c0_58], %75 {strides = array<i32>} : memref<8x1xf32, #tpu.memory_space<vmem>>, vector<8x1xf32>,
    } else {
    }
    return
  }
  func.func @transform_0(%arg0: i32) -> (i32, i32) {
    %c0_i32 = arith.constant 0 : i32
    %c0_i32_0 = arith.constant 0 : i32
    return %arg0, %c0_i32 : i32, i32
  }
  func.func @transform_1(%arg0: i32) -> (i32, i32) {
    %c0_i32 = arith.constant 0 : i32
    %c0_i32_0 = arith.constant 0 : i32
    return %arg0, %c0_i32 : i32, i32
  }
  func.func @transform_2(%arg0: i32) -> (i32, i32) {
    %c0_i32 = arith.constant 0 : i32
    %c0_i32_0 = arith.constant 0 : i32
    return %arg0, %c0_i32 : i32, i32
  }
  func.func @transform_3(%arg0: i32) -> (i32, i32) {
    %c0_i32 = arith.constant 0 : i32
    %c0_i32_0 = arith.constant 0 : i32
    return %arg0, %c0_i32 : i32, i32
  }
  func.func @transform_4(%arg0: i32) -> (i32, i32) {
    %c0_i32 = arith.constant 0 : i32
    %c0_i32_0 = arith.constant 0 : i32
    return %arg0, %c0_i32 : i32, i32
  }
  func.func @transform_5(%arg0: i32) -> (i32, i32) {
    %c0_i32 = arith.constant 0 : i32
    %c0_i32_0 = arith.constant 0 : i32
    return %arg0, %c0_i32 : i32, i32
  }
  func.func @transform_6(%arg0: i32) -> (i32, i32) {
    %c0_i32 = arith.constant 0 : i32
    %c0_i32_0 = arith.constant 0 : i32
    return %arg0, %c0_i32 : i32, i32
  }
  func.func @transform_7(%arg0: i32) -> (i32, i32) {
    %c0_i32 = arith.constant 0 : i32
    %c0_i32_0 = arith.constant 0 : i32
    return %arg0, %c0_i32 : i32, i32
  }
  func.func @transform_8(%arg0: i32) -> (i32, i32) {
    %c0_i32 = arith.constant 0 : i32
    %c0_i32_0 = arith.constant 0 : i32
    %c0_i32_1 = arith.constant 0 : i32
    return %c0_i32, %c0_i32_0 : i32, i32
  }
}

</mosaic_0001>

<bundles_post_ra>
// kernel: tpu_custom_call.1
= control target key start
LH: loop header
LB: loop body
LE: loop exit
PB: predicated region body
PF: predicated region fallthrough
CT: control target
= control target key end

     0   :  { %14 = vsyncpa [#allocation4], 0  ;;  %s1171_s0 = inlined_call_operand.hbm [shape: f32[8,512], index: 0, kind: input, shape index: {}]   ;;  %s1172_s1 = inlined_call_operand.hbm [shape: f32[8,512], index: 1, kind: input, shape index: {}]   ;;  %s1173_s2 = inlined_call_operand.hbm [shape: f32[8,512], index: 2, kind: input, shape index: {}]   ;;  %s1174_s3 = inlined_call_operand.hbm [shape: f32[8,512], index: 3, kind: input, shape index: {}]   ;;  %s1175_s4 = inlined_call_operand.hbm [shape: f32[8,512], index: 4, kind: input, shape index: {}]   ;;  %s1176_s5 = inlined_call_operand.hbm [shape: f32[8,512], index: 5, kind: input, shape index: {}]   ;;  %s1177_s6 = inlined_call_operand.hbm [shape: f32[8,512], index: 6, kind: input, shape index: {}]   ;;  %s1178_s7 = inlined_call_operand.hbm [shape: f32[8,512], index: 7, kind: output, shape index: {0}]   ;;  %s1179_s8 = inlined_call_operand.vmem [shape: f32[8,1], index: 8, kind: output, shape index: {1}]  }
   0x1   :  { %15 = vsyncpa [#allocation7], 0 }
   0x2   :  { %16 = vsyncpa [#allocation10], 0 }
   0x3   :  { %17 = vsyncpa [#allocation13], 0 }
   0x4   :  { %18 = vsyncpa [#allocation5], 0  ;;  %s868_s27 = smov [#allocation6]   ;;  %s869_s29 = smov [#allocation9]  }
   0x5   :  { %s35_s28 = sshll.u32 %s868_s27, 4  ;;  %s55_s30 = sshll.u32 %s869_s29, 4  ;;  %s36_s28 = int_to_ptr.vmem [resolvable:$true] %s35_s28  ;;  %s56_s30 = int_to_ptr.vmem [resolvable:$true] %s55_s30 }
   0x6   :  { %s682_s11 = scalar_lea.hbm %s1172_s1, 512 }
   0x7   :  { %p683_p0 = scmp.ne.s32.totalorder %s1172_s1, %s682_s11  ;;  %p686_p1 = scmp.lt.u32.totalorder %s682_s11, %s1172_s1 }
   0x9   :  { %p688_p2 = pnand %p686_p1, %p683_p0 }
   0xb   :  { %691 = shalt.err (!%p688_p2)
}
   0xc   :  { %s692_s16 = scalar_lea.vmem %s36_s28, 512  ;;  %p697_p4 = scmp.lt.s32.totalorder %s36_s28, %s36_s28 }
   0xd   :  { %p693_p3 = scmp.ne.s32.totalorder %s36_s28, %s692_s16  ;;  %p698_p5 = scmp.lt.s32.totalorder %s692_s16, %s692_s16 }
   0xf   :  { %p699_p6 = por %p698_p5, %p697_p4 }
  0x11   :  { %p700_p7 = pnand %p699_p6, %p693_p3 }
  0x13   :  { %703 = shalt.err (!%p700_p7)
}
  0x14   :  { %38 = dma.hbm_to_vmem [thread:$0]  %s1172_s1, 512, %s36_s28, [#allocation7]  }
  0x15   :  { %s704_s21 = scalar_lea.hbm %s1174_s3, 512 }
  0x16   :  { %p705_p8 = scmp.ne.s32.totalorder %s1174_s3, %s704_s21  ;;  %p708_p9 = scmp.lt.u32.totalorder %s704_s21, %s1174_s3 }
  0x18   :  { %p710_p10 = pnand %p708_p9, %p705_p8 }
  0x1a   :  { %713 = shalt.err (!%p710_p10)
}
  0x1b   :  { %s714_s26 = scalar_lea.vmem %s56_s30, 512  ;;  %p719_p12 = scmp.lt.s32.totalorder %s56_s30, %s56_s30 }
  0x1c   :  { %p715_p11 = scmp.ne.s32.totalorder %s56_s30, %s714_s26  ;;  %p720_p13 = scmp.lt.s32.totalorder %s714_s26, %s714_s26 }
  0x1e   :  { %p721_p0 = por %p720_p13, %p719_p12 }
  0x20   :  { %p722_p1 = pnand %p721_p0, %p715_p11 }
  0x22   :  { %725 = shalt.err (!%p722_p1)
}
  0x23   :  { %58 = dma.hbm_to_vmem [thread:$0]  %s1174_s3, 512, %s56_s30, [#allocation10]  }
  0x24   :  { %s870_s28 = smov [#allocation12]   ;;  %s871_s9 = smov [#allocation3]  }
  0x25   :  { %s75_s29 = sshll.u32 %s870_s28, 4  ;;  %s25_s10 = sshll.u32 %s871_s9, 4  ;;  %s76_s29 = int_to_ptr.vmem [resolvable:$true] %s75_s29  ;;  %s26_s10 = int_to_ptr.vmem [resolvable:$true] %s25_s10 }
  0x26   :  { %s726_s13 = scalar_lea.hbm %s1176_s5, 512 }
  0x27   :  { %p727_p2 = scmp.ne.s32.totalorder %s1176_s5, %s726_s13  ;;  %p730_p3 = scmp.lt.u32.totalorder %s726_s13, %s1176_s5 }
  0x29   :  { %p732_p4 = pnand %p730_p3, %p727_p2 }
  0x2b   :  { %735 = shalt.err (!%p732_p4)
}
  0x2c   :  { %s736_s3 = scalar_lea.vmem %s76_s29, 512  ;;  %p741_p6 = scmp.lt.s32.totalorder %s76_s29, %s76_s29 }
  0x2d   :  { %p737_p5 = scmp.ne.s32.totalorder %s76_s29, %s736_s3  ;;  %p742_p7 = scmp.lt.s32.totalorder %s736_s3, %s736_s3 }
  0x2f   :  { %p743_p8 = por %p742_p7, %p741_p6 }
  0x31   :  { %p744_p9 = pnand %p743_p8, %p737_p5 }
  0x33   :  { %747 = shalt.err (!%p744_p9)
}
  0x34   :  { %78 = dma.hbm_to_vmem [thread:$0]  %s1176_s5, 512, %s76_s29, [#allocation13]  }
  0x35   :  { %s748_s21 = scalar_lea.hbm %s1171_s0, 512 }
  0x36   :  { %p749_p10 = scmp.ne.s32.totalorder %s1171_s0, %s748_s21  ;;  %p752_p11 = scmp.lt.u32.totalorder %s748_s21, %s1171_s0 }
  0x38   :  { %p754_p12 = pnand %p752_p11, %p749_p10 }
  0x3a   :  { %757 = shalt.err (!%p754_p12)
}
  0x3b   :  { %s758_s26 = scalar_lea.vmem %s26_s10, 512  ;;  %p763_p0 = scmp.lt.s32.totalorder %s26_s10, %s26_s10 }
  0x3c   :  { %p759_p13 = scmp.ne.s32.totalorder %s26_s10, %s758_s26  ;;  %p764_p1 = scmp.lt.s32.totalorder %s758_s26, %s758_s26 }
  0x3e   :  { %p765_p2 = por %p764_p1, %p763_p0 }
  0x40   :  { %p766_p3 = pnand %p765_p2, %p759_p13 }
  0x42   :  { %769 = shalt.err (!%p766_p3)
}
  0x43   :  { %28 = dma.hbm_to_vmem [thread:$0]  %s1171_s0, 512, %s26_s10, [#allocation4]  }
  0x44   :  { %s872_s27 = smov [#allocation8]   ;;  %s873_s29 = smov [#allocation11]  }
  0x45   :  { %s45_s28 = sshll.u32 %s872_s27, 4  ;;  %s65_s9 = sshll.u32 %s873_s29, 4  ;;  %s46_s28 = int_to_ptr.vmem [resolvable:$true] %s45_s28  ;;  %s66_s9 = int_to_ptr.vmem [resolvable:$true] %s65_s9 }
  0x46   :  { %s770_s13 = scalar_lea.hbm %s1173_s2, 512 }
  0x47   :  { %p771_p4 = scmp.ne.s32.totalorder %s1173_s2, %s770_s13  ;;  %p774_p5 = scmp.lt.u32.totalorder %s770_s13, %s1173_s2 }
  0x49   :  { %p776_p6 = pnand %p774_p5, %p771_p4 }
  0x4b   :  { %779 = shalt.err (!%p776_p6)
}
  0x4c   :  { %s780_s0 = scalar_lea.vmem %s46_s28, 512  ;;  %p785_p8 = scmp.lt.s32.totalorder %s46_s28, %s46_s28 }
  0x4d   :  { %p781_p7 = scmp.ne.s32.totalorder %s46_s28, %s780_s0  ;;  %p786_p9 = scmp.lt.s32.totalorder %s780_s0, %s780_s0 }
  0x4f   :  { %p787_p10 = por %p786_p9, %p785_p8 }
  0x51   :  { %p788_p11 = pnand %p787_p10, %p781_p7 }
  0x53   :  { %791 = shalt.err (!%p788_p11)
}
  0x54   :  { %48 = dma.hbm_to_vmem [thread:$0]  %s1173_s2, 512, %s46_s28, [#allocation7]  }
  0x55   :  { %s792_s19 = scalar_lea.hbm %s1175_s4, 512 }
  0x56   :  { %p793_p12 = scmp.ne.s32.totalorder %s1175_s4, %s792_s19  ;;  %p796_p13 = scmp.lt.u32.totalorder %s792_s19, %s1175_s4 }
  0x58   :  { %p798_p0 = pnand %p796_p13, %p793_p12 }
  0x5a   :  { %801 = shalt.err (!%p798_p0)
}
  0x5b   :  { %s802_s24 = scalar_lea.vmem %s66_s9, 512  ;;  %p807_p2 = scmp.lt.s32.totalorder %s66_s9, %s66_s9 }
  0x5c   :  { %p803_p1 = scmp.ne.s32.totalorder %s66_s9, %s802_s24  ;;  %p808_p3 = scmp.lt.s32.totalorder %s802_s24, %s802_s24 }
  0x5e   :  { %p809_p4 = por %p808_p3, %p807_p2 }
  0x60   :  { %p810_p5 = pnand %p809_p4, %p803_p1 }
  0x62   :  { %813 = shalt.err (!%p810_p5)
}
  0x63   :  { %68 = dma.hbm_to_vmem [thread:$0]  %s1175_s4, 512, %s66_s9, [#allocation10]  }
  0x64   :  { %s874_s26 = smov [#allocation14]   ;;  %s814_s28 = scalar_lea.hbm %s1177_s6, 512 }
  0x65   :  { %s85_s5 = sshll.u32 %s874_s26, 4  ;;  %p815_p6 = scmp.ne.s32.totalorder %s1177_s6, %s814_s28  ;;  %s86_s5 = int_to_ptr.vmem [resolvable:$true] %s85_s5 }
  0x66   :  { %p818_p7 = scmp.lt.u32.totalorder %s814_s28, %s1177_s6 }
  0x68   :  { %p820_p8 = pnand %p818_p7, %p815_p6 }
  0x6a   :  { %823 = shalt.err (!%p820_p8)
}
  0x6b   :  { %s824_s14 = scalar_lea.vmem %s86_s5, 512  ;;  %p829_p10 = scmp.lt.s32.totalorder %s86_s5, %s86_s5 }
  0x6c   :  { %p825_p9 = scmp.ne.s32.totalorder %s86_s5, %s824_s14  ;;  %p830_p11 = scmp.lt.s32.totalorder %s824_s14, %s824_s14 }
  0x6e   :  { %p831_p12 = por %p830_p11, %p829_p10 }
  0x70   :  { %p832_p13 = pnand %p831_p12, %p825_p9 }
  0x72   :  { %835 = shalt.err (!%p832_p13)
}
  0x73   :  { %88 = dma.hbm_to_vmem [thread:$0]  %s1177_s6, 512, %s86_s5, [#allocation13]  }
  0x74   :  { %858 = dma.done.wait [#allocation4], 512  }
  0x75   :  { %859 = vsyncadd [#allocation4], 4294966784 }
  0x76   :  { %860 = dma.done.wait [#allocation7], 1024  }
  0x77   :  { %861 = vsyncadd [#allocation7], 4294966272 }
  0x78   :  { %862 = dma.done.wait [#allocation10], 1024  }
  0x79   :  { %863 = vsyncadd [#allocation10], 4294966272 }
  0x7a   :  { %864 = dma.done.wait [#allocation13], 1024  }
  0x7b   :  { %865 = vsyncadd [#allocation13], 4294966272  ;;  %v875_v0 = vmov 0.0   ;;  %v876_v1 = vmov 1966171168   ;;  %v236_v3 = vlaneseq  ;;  %v118_v6 = vld [vmem:[#allocation3] sm:$0xff] }
  0x7c   :  { %114 = vst [vmem:[#allocation2] sm:$0xff] %v875_v0  ;;  %115 = vst [vmem:[#allocation2 + $0x8] sm:$0xff] %v875_v0  ;;  %v234_v2 = vunpack.c.l.s4 %v876_v1  ;;  %v119_v7 = vld [vmem:[#allocation3 + $0x8] sm:$0xff]  ;;  %v120_v8 = vld [vmem:[#allocation3 + $0x10] sm:$0xff]  ;;  %v142_v12 = vsub.f32 1.0, %v118_v6  ;;  %s877_s6 = smov [#allocation15]  }
  0x7d   :  { %116 = vst [vmem:[#allocation2 + $0x10] sm:$0xff] %v875_v0  ;;  %117 = vst [vmem:[#allocation2 + $0x18] sm:$0xff] %v875_v0  ;;  %v237_v5 = vshrl.u32 %v236_v3, 7  ;;  %v121_v9 = vld [vmem:[#allocation3 + $0x18] sm:$0xff]  ;;  %v122_v10 = vld [vmem:[#allocation6] sm:$0xff]  ;;  %v143_v13 = vsub.f32 1.0, %v119_v7 }
  0x7e   :  { %v235_v4 = vunpack.c.0.s8 %v234_v2  ;;  %v123_v11 = vld [vmem:[#allocation6 + $0x8] sm:$0xff]  ;;  %v144_v14 = vsub.f32 1.0, %v120_v8  ;;  %v124_v15 = vld [vmem:[#allocation6 + $0x10] sm:$0xff]  ;;  %v125_v16 = vld [vmem:[#allocation6 + $0x18] sm:$0xff]  ;;  %vm138_vm0 = vcmp.gt.f32.partialorder %v122_v10, 0.5  ;;  %v145_v18 = vsub.f32 1.0, %v121_v9 }
  0x7f   :  { %v1008_v17 = vld [vmem:[#allocation8] sm:$0xff]  ;;  %vm139_vm1 = vcmp.gt.f32.partialorder %v123_v11, 0.5  ;;  %v1012_v20 = vld [vmem:[#allocation8 + $0x8] sm:$0xff]  ;;  %v1014_v21 = vld [vmem:[#allocation8 + $0x10] sm:$0xff]  ;;  %vm140_vm2 = vcmp.gt.f32.partialorder %v124_v15, 0.5  ;;  %vm141_vm3 = vcmp.gt.f32.partialorder %v125_v16, 0.5  ;;  %v146_v24 = vsel %vm138_vm0, %v118_v6, %v142_v12 }
  0x80   :  { %v1010_v19 = vsub.s32 %v235_v4, %v237_v5  ;;  %v1016_v22 = vld [vmem:[#allocation8 + $0x18] sm:$0xff]  ;;  %v1019_v23 = vmul.f32 %v1008_v17, %v122_v10  ;;  %v1022_v25 = vmul.f32 %v1012_v20, %v123_v11  ;;  %v1025_v26 = vmul.f32 %v1014_v21, %v124_v15  ;;  %v182_v35 = vld [vmem:[#allocation9] sm:$0xff]  ;;  %v183_v36 = vld [vmem:[#allocation9 + $0x8] sm:$0xff]  ;;  %s648_s15 = sshll.u32 %s877_s6, 4  ;;  %s649_s15 = int_to_ptr.vmem [resolvable:$true] %s648_s15 }
  0x81   :  { %v1028_v27 = vmul.f32 %v1016_v22, %v125_v16  ;;  %v147_v28 = vsel %vm139_vm1, %v119_v7, %v143_v13  ;;  %v148_v30 = vsel %vm140_vm2, %v120_v8, %v144_v14  ;;  %v149_v31 = vsel %vm141_vm3, %v121_v9, %v145_v18  ;;  %v184_v37 = vld [vmem:[#allocation9 + $0x10] sm:$0xff]  ;;  %v185_v38 = vld [vmem:[#allocation9 + $0x18] sm:$0xff]  ;;  %v186_v42 = vld [vmem:[#allocation11] sm:$0xff]  ;;  %s836_s16 = scalar_lea.vmem %s649_s15, 512  ;;  %p841_p1 = scmp.lt.s32.totalorder %s649_s15, %s649_s15 }
  0x82   :  { %v1032_v29 = vsub.f32 %v1008_v17, %v1019_v23  ;;  %674 = vlog2.f32 %v146_v24  ;;  %v1036_v32 = vsub.f32 %v1012_v20, %v1022_v25  ;;  %v1040_v33 = vsub.f32 %v1014_v21, %v1025_v26  ;;  %v187_v43 = vld [vmem:[#allocation11 + $0x8] sm:$0xff]  ;;  %v188_v44 = vld [vmem:[#allocation11 + $0x10] sm:$0xff]  ;;  %v189_v48 = vld [vmem:[#allocation11 + $0x18] sm:$0xff]  ;;  %p837_p0 = scmp.ne.s32.totalorder %s649_s15, %s836_s16  ;;  %p842_p2 = scmp.lt.s32.totalorder %s836_s16, %s836_s16 }
  0x83   :  { %v1044_v34 = vsub.f32 %v1016_v22, %v1028_v27  ;;  %676 = vlog2.f32 %v147_v28  ;;  %v265_v39 = vrot.slane %v1019_v23, 4  ;;  %v271_v40 = vrot.slane %v1022_v25, 4 }
  0x84   :  { %678 = vlog2.f32 %v148_v30  ;;  %v277_v41 = vrot.slane %v1025_v26, 4  ;;  %v283_v45 = vrot.slane %v1028_v27, 4  ;;  %v323_v46 = vrot.slane %v1032_v29, 4  ;;  %p843_p3 = por %p842_p2, %p841_p1 }
  0x85   :  { %680 = vlog2.f32 %v149_v31  ;;  %v329_v47 = vrot.slane %v1036_v32, 4  ;;  %v190_v49 = vsub.f32 %v182_v35, %v186_v42  ;;  %v191_v50 = vsub.f32 %v183_v36, %v187_v43 }
  0x86   :  { %v192_v51 = vsub.f32 %v184_v37, %v188_v44  ;;  %v266_v52 = vadd.f32 %v265_v39, %v1019_v23  ;;  %v193_v53 = vsub.f32 %v185_v38, %v189_v48  ;;  %v272_v54 = vadd.f32 %v271_v40, %v1022_v25  ;;  %p844_p4 = pnand %p843_p3, %p837_p0 }
  0x87   :  { %v278_v55 = vadd.f32 %v277_v41, %v1025_v26  ;;  %v284_v56 = vadd.f32 %v283_v45, %v1028_v27  ;;  %v1056_v57 = vand.u32 2147483647, %v190_v49  ;;  %v1058_v58 = vand.u32 2147483647, %v191_v50 }
  0x88   :  { %v1060_v59 = vand.u32 2147483647, %v192_v51  ;;  %v324_v60 = vadd.f32 %v323_v46, %v1032_v29  ;;  %v1063_v61 = vand.u32 2147483647, %v193_v53  ;;  %v267_v62 = vrot.slane %v266_v52, 2 }
  0x89   :  { %v273_v63 = vrot.slane %v272_v54, 2  ;;  %v279_v0 = vrot.slane %v278_v55, 2  ;;  %v285_v1 = vrot.slane %v284_v56, 2  ;;  %v330_v4 = vadd.f32 %v329_v47, %v1036_v32 }
  0x8a   :  { %v325_v2 = vrot.slane %v324_v60, 2  ;;  %v335_v5 = vrot.slane %v1040_v33, 4  ;;  %v268_v6 = vadd.f32 %v267_v62, %v266_v52  ;;  %v341_v9 = vrot.slane %v1044_v34, 4 }
  0x8b   :  { %v274_v7 = vadd.f32 %v273_v63, %v272_v54  ;;  %v280_v8 = vadd.f32 %v279_v0, %v278_v55  ;;  %v286_v11 = vadd.f32 %v285_v1, %v284_v56  ;;  %v331_v13 = vrot.slane %v330_v4, 2 }
  0x8c   :  { %v675_v10 = vpop.eup %674  ;;  %v326_v12 = vadd.f32 %v325_v2, %v324_v60  ;;  %v336_v14 = vadd.f32 %v335_v5, %v1040_v33  ;;  %v269_v18 = vrot.slane %v268_v6, 1  ;;  %vm1070_vm4 = vcmp.lt.s32.totalorder %v236_v3, 512 }
  0x8d   :  { %v677_v15 = vpop.eup %676  ;;  %v151_v16 = vmul.f32 0.6931472, %v675_v10  ;;  %v275_v24 = vrot.slane %v274_v7, 1  ;;  %v281_v28 = vrot.slane %v280_v8, 1  ;;  %v287_v35 = vrot.slane %v286_v11, 1 }
  0x8e   :  { %v679_v30 = vpop.eup %678  ;;  %v153_v31 = vmul.f32 0.6931472, %v677_v15  ;;  %v327_v36 = vrot.slane %v326_v12, 1  ;;  %v332_v37 = vadd.f32 %v331_v13, %v330_v4  ;;  %v270_v41 = vadd.f32 %v269_v18, %v268_v6  ;;  %v264_v13 = vld [vmem:[#allocation2 + $0x1] ss:$8 sm:$0xf] }
  0x8f   :  { %v681_v38 = vpop.eup %680  ;;  %v155_v39 = vmul.f32 0.6931472, %v679_v30  ;;  %v158_v40 = vmax.f32 %v151_v16, -100.0  ;;  %v276_v42 = vadd.f32 %v275_v24, %v274_v7  ;;  %v282_v45 = vadd.f32 %v281_v28, %v280_v8  ;;  %v174_v30 = vld [vmem:[#allocation14] sm:$0xff] }
  0x90   :  { %v157_v43 = vmul.f32 0.6931472, %v681_v38  ;;  %v159_v44 = vmax.f32 %v153_v31, -100.0  ;;  %v288_v46 = vadd.f32 %v287_v35, %v286_v11  ;;  %v328_v51 = vadd.f32 %v327_v36, %v326_v12  ;;  %v175_v31 = vld [vmem:[#allocation14 + $0x8] sm:$0xff] }
  0x91   :  { %v160_v47 = vmax.f32 %v155_v39, -100.0  ;;  %v162_v48 = vsub.f32 0.0, %v158_v40  ;;  %v293_v50 = vcombine.low %v270_v41, %v276_v42  ;;  %v333_v55 = vrot.slane %v332_v37, 1 }
  0x92   :  { %v161_v52 = vmax.f32 %v157_v43, -100.0  ;;  %v163_v53 = vsub.f32 0.0, %v159_v44  ;;  %v294_v54 = vcombine.low %v282_v45, %v288_v46  ;;  %v337_v15 = vrot.slane %v336_v14, 2 }
  0x93   :  { %v164_v56 = vsub.f32 0.0, %v160_v47  ;;  %v166_v60 = vmul.f32 %v162_v48, %v1032_v29  ;;  %v199_v62 = vmul.f32 %v162_v48, %v1019_v23  ;;  %v301_v63 = vrot.slane %v293_v50, %v1010_v19 }
  0x94   :  { %v165_v0 = vsub.f32 0.0, %v161_v52  ;;  %v167_v1 = vmul.f32 %v163_v53, %v1036_v32  ;;  %v200_v3 = vmul.f32 %v163_v53, %v1022_v25  ;;  %v308_v2 = vrot.slane %v294_v54, %v1010_v19 }
  0x95   :  { %v168_v4 = vmul.f32 %v164_v56, %v1040_v33  ;;  %170 = vst [vmem:[#allocation15] sm:$0xff] %v166_v60  ;;  %v201_v5 = vmul.f32 %v164_v56, %v1025_v26  ;;  %v203_v6 = vrot.slane %v199_v62, 4  ;;  %v334_v7 = vadd.f32 %v333_v55, %v332_v37 }
  0x96   :  { %v169_v29 = vmul.f32 %v165_v0, %v1044_v34  ;;  %171 = vst [vmem:[#allocation15 + $0x8] sm:$0xff] %v167_v1  ;;  %v202_v8 = vmul.f32 %v165_v0, %v1028_v27  ;;  %v209_v10 = vrot.slane %v200_v3, 4  ;;  %v309_v11 = vcombine.low %v301_v63, %v308_v2 }
  0x97   :  { %172 = vst [vmem:[#allocation15 + $0x10] sm:$0xff] %v168_v4  ;;  %v204_v32 = vadd.f32 %v203_v6, %v199_v62  ;;  %v215_v12 = vrot.slane %v201_v5, 4  ;;  %v342_v16 = vadd.f32 %v341_v9, %v1044_v34  ;;  %v351_v28 = vcombine.low %v328_v51, %v334_v7  ;;  %v176_v34 = vld [vmem:[#allocation14 + $0x10] sm:$0xff]  ;;  %v177_v9 = vld [vmem:[#allocation14 + $0x18] sm:$0xff] }
  0x98   :  { %173 = vst [vmem:[#allocation15 + $0x18] sm:$0xff] %v169_v29  ;;  %v210_v33 = vadd.f32 %v209_v10, %v200_v3  ;;  %v221_v18 = vrot.slane %v202_v8, 4  ;;  %v1086_v24 = vrot.slane %v309_v11, %v1010_v19  ;;  %v338_v37 = vadd.f32 %v337_v15, %v336_v14 }
  0x99   :  { %v205_v35 = vrot.slane %v204_v32, 2  ;;  %v216_v36 = vadd.f32 %v215_v12, %v201_v5  ;;  %v343_v38 = vrot.slane %v342_v16, 2  ;;  %v359_v42 = vrot.slane %v351_v28, %v1010_v19 }
  0x9a   :  { %v211_v39 = vrot.slane %v210_v33, 2  ;;  %v222_v40 = vadd.f32 %v221_v18, %v202_v8  ;;  %v318_v41 = vadd.f32 %v1086_v24, %v264_v13  ;;  %v339_v45 = vrot.slane %v338_v37, 1 }
  0x9b   :  { %v206_v43 = vadd.f32 %v205_v35, %v204_v32  ;;  %v217_v44 = vrot.slane %v216_v36, 2  ;;  %v344_v46 = vadd.f32 %v343_v38, %v342_v16  ;;  %v381_v14 = vmul.f32 %v174_v30, %v1019_v23 }
  0x9c   :  { %v212_v47 = vadd.f32 %v211_v39, %v210_v33  ;;  %v223_v48 = vrot.slane %v222_v40, 2  ;;  %319 = vst.msk [vmem:[#allocation2 + $0x1] ss:$8 sm:$0xf] %vm1070_vm4, %v318_v41  ;;  %v382_v50 = vmul.f32 %v175_v31, %v1022_v25  ;;  %v340_v53 = vadd.f32 %v339_v45, %v338_v37 }
  0x9d   :  { %v207_v51 = vrot.slane %v206_v43, 1  ;;  %v218_v52 = vadd.f32 %v217_v44, %v216_v36  ;;  %v345_v54 = vrot.slane %v344_v46, 1  ;;  %v383_v60 = vmul.f32 %v176_v34, %v1025_v26  ;;  %v322_v39 = vld [vmem:[#allocation2 + $0x2] ss:$8 sm:$0xf] }
  0x9e   :  { %v213_v55 = vrot.slane %v212_v47, 1  ;;  %v224_v56 = vadd.f32 %v223_v48, %v222_v40  ;;  %v384_v62 = vmul.f32 %v177_v9, %v1028_v27  ;;  %v385_v3 = vrot.slane %v381_v14, 4 }
  0x9f   :  { %v208_v63 = vadd.f32 %v207_v51, %v206_v43  ;;  %v219_v0 = vrot.slane %v218_v52, 1  ;;  %v346_v1 = vadd.f32 %v345_v54, %v344_v46  ;;  %v391_v5 = vrot.slane %v382_v50, 4  ;;  %v198_v46 = vld [vmem:[#allocation2] ss:$8 sm:$0xf] }
  0xa0   :  { %v214_v2 = vadd.f32 %v213_v55, %v212_v47  ;;  %v225_v4 = vrot.slane %v224_v56, 1  ;;  %v397_v23 = vrot.slane %v383_v60, 4  ;;  %v386_v7 = vadd.f32 %v385_v3, %v381_v14  ;;  %v1105_v55 = vld [vmem:[#allocation12] sm:$0xff] }
  0xa1   :  { %v220_v6 = vadd.f32 %v219_v0, %v218_v52  ;;  %v352_v25 = vcombine.low %v340_v53, %v346_v1  ;;  %v403_v29 = vrot.slane %v384_v62, 4  ;;  %v392_v11 = vadd.f32 %v391_v5, %v382_v50  ;;  %v504_v52 = vld [vmem:[#allocation2 + $0x5] ss:$8 sm:$0xf] }
  0xa2   :  { %v226_v8 = vadd.f32 %v225_v4, %v224_v56  ;;  %v231_v10 = vcombine.low %v208_v63, %v214_v2  ;;  %v398_v32 = vadd.f32 %v397_v23, %v383_v60  ;;  %v387_v12 = vrot.slane %v386_v7, 2  ;;  %v1107_v56 = vld [vmem:[#allocation12 + $0x8] sm:$0xff]  ;;  %v1112_v2 = vld [vmem:[#allocation12 + $0x10] sm:$0xff]  ;;  %v1114_v4 = vld [vmem:[#allocation12 + $0x18] sm:$0xff] }
  0xa3   :  { %v366_v26 = vrot.slane %v352_v25, %v1010_v19  ;;  %v404_v27 = vadd.f32 %v403_v29, %v384_v62  ;;  %v443_v13 = vmul.f32 %v174_v30, %v1008_v17  ;;  %v393_v33 = vrot.slane %v392_v11, 2 }
  0xa4   :  { %v232_v15 = vcombine.low %v220_v6, %v226_v8  ;;  %v239_v16 = vrot.slane %v231_v10, %v1010_v19  ;;  %v399_v18 = vrot.slane %v398_v32, 2  ;;  %v388_v35 = vadd.f32 %v387_v12, %v386_v7 }
  0xa5   :  { %v367_v28 = vcombine.low %v359_v42, %v366_v26  ;;  %v405_v36 = vrot.slane %v404_v27, 2  ;;  %v444_v37 = vmul.f32 %v175_v31, %v1012_v20  ;;  %v394_v40 = vadd.f32 %v393_v33, %v392_v11 }
  0xa6   :  { %v246_v38 = vrot.slane %v232_v15, %v1010_v19  ;;  %v400_v41 = vadd.f32 %v399_v18, %v398_v32  ;;  %v445_v43 = vmul.f32 %v176_v34, %v1014_v21  ;;  %v389_v17 = vrot.slane %v388_v35, 1 }
  0xa7   :  { %v374_v44 = vrot.slane %v367_v28, %v1010_v19  ;;  %v406_v30 = vadd.f32 %v405_v36, %v404_v27  ;;  %v446_v45 = vmul.f32 %v177_v9, %v1016_v22  ;;  %v395_v42 = vrot.slane %v394_v40, 1  ;;  %v380_v28 = vld [vmem:[#allocation2 + $0x3] ss:$8 sm:$0xf] }
  0xa8   :  { %v247_v47 = vcombine.low %v239_v16, %v246_v38  ;;  %v401_v48 = vrot.slane %v400_v41, 1  ;;  %v447_v14 = vrot.slane %v443_v13, 4  ;;  %v390_v20 = vadd.f32 %v389_v17, %v388_v35 }
  0xa9   :  { %v376_v50 = vadd.f32 %v374_v44, %v322_v39  ;;  %v407_v31 = vrot.slane %v406_v30, 1  ;;  %v453_v51 = vrot.slane %v444_v37, 4  ;;  %v396_v54 = vadd.f32 %v395_v42, %v394_v40 }
  0xaa   :  { %v254_v53 = vrot.slane %v247_v47, %v1010_v19  ;;  %v402_v21 = vadd.f32 %v401_v48, %v400_v41  ;;  %v448_v34 = vadd.f32 %v447_v14, %v443_v13  ;;  %v459_v60 = vrot.slane %v445_v43, 4 }
  0xab   :  { %377 = vst.msk [vmem:[#allocation2 + $0x2] ss:$8 sm:$0xf] %vm1070_vm4, %v376_v50  ;;  %v408_v22 = vadd.f32 %v407_v31, %v406_v30  ;;  %v454_v9 = vadd.f32 %v453_v51, %v444_v37  ;;  %v465_v62 = vrot.slane %v446_v45, 4  ;;  %v413_v0 = vcombine.low %v390_v20, %v396_v54 }
  0xac   :  { %v256_v63 = vadd.f32 %v254_v53, %v198_v46  ;;  %v449_v1 = vrot.slane %v448_v34, 2  ;;  %v505_v3 = vadd.f32 %v504_v52, %v1086_v24  ;;  %v460_v6 = vadd.f32 %v459_v60, %v445_v43 }
  0xad   :  { %v414_v5 = vcombine.low %v402_v21, %v408_v22  ;;  %v455_v23 = vrot.slane %v454_v9, 2  ;;  %v466_v25 = vadd.f32 %v465_v62, %v446_v45  ;;  %v421_v7 = vrot.slane %v413_v0, %v1010_v19 }
  0xae   :  { %261 = vst.msk [vmem:[#allocation2] ss:$8 sm:$0xf] %vm1070_vm4, %v256_v63  ;;  %v450_v29 = vadd.f32 %v449_v1, %v448_v34  ;;  %506 = vst.msk [vmem:[#allocation2 + $0x5] ss:$8 sm:$0xf] %vm1070_vm4, %v505_v3  ;;  %v510_v24 = vmul.f32 %v1056_v57, %v1105_v55  ;;  %v511_v8 = vmul.f32 %v1058_v58, %v1107_v56 }
  0xaf   :  { %v428_v10 = vrot.slane %v414_v5, %v1010_v19  ;;  %v456_v11 = vadd.f32 %v455_v23, %v454_v9  ;;  %v461_v32 = vrot.slane %v460_v6, 2  ;;  %v467_v26 = vrot.slane %v466_v25, 2 }
  0xb0   :  { %v451_v12 = vrot.slane %v450_v29, 1  ;;  %v512_v27 = vmul.f32 %v1060_v59, %v1112_v2  ;;  %v513_v13 = vmul.f32 %v1063_v61, %v1114_v4  ;;  %v514_v15 = vrot.slane %v510_v24, 4 }
  0xb1   :  { %v429_v16 = vcombine.low %v421_v7, %v428_v10  ;;  %v457_v33 = vrot.slane %v456_v11, 1  ;;  %v462_v18 = vadd.f32 %v461_v32, %v460_v6  ;;  %v468_v57 = vadd.f32 %v467_v26, %v466_v25  ;;  %v442_v25 = vld [vmem:[#allocation2 + $0x4] ss:$8 sm:$0xf] }
  0xb2   :  { %v452_v35 = vadd.f32 %v451_v12, %v450_v29  ;;  %v515_v58 = vadd.f32 %v514_v15, %v510_v24  ;;  %v520_v36 = vrot.slane %v511_v8, 4  ;;  %v526_v37 = vrot.slane %v512_v27, 4 }
  0xb3   :  { %v436_v38 = vrot.slane %v429_v16, %v1010_v19  ;;  %v458_v39 = vadd.f32 %v457_v33, %v456_v11  ;;  %v463_v40 = vrot.slane %v462_v18, 1  ;;  %v469_v41 = vrot.slane %v468_v57, 1 }
  0xb4   :  { %v516_v43 = vrot.slane %v515_v58, 2  ;;  %v521_v59 = vadd.f32 %v520_v36, %v511_v8  ;;  %v527_v44 = vadd.f32 %v526_v37, %v512_v27  ;;  %v532_v17 = vrot.slane %v513_v13, 4 }
  0xb5   :  { %v438_v61 = vadd.f32 %v436_v38, %v380_v28  ;;  %v464_v30 = vadd.f32 %v463_v40, %v462_v18  ;;  %v470_v45 = vadd.f32 %v469_v41, %v468_v57  ;;  %v475_v46 = vcombine.low %v452_v35, %v458_v39  ;;  %v509_v40 = vld [vmem:[#allocation2 + $0x6] ss:$8 sm:$0xf] }
  0xb6   :  { %v517_v47 = vadd.f32 %v516_v43, %v515_v58  ;;  %v522_v42 = vrot.slane %v521_v59, 2  ;;  %v528_v48 = vrot.slane %v527_v44, 2  ;;  %v533_v14 = vadd.f32 %v532_v17, %v513_v13 }
  0xb7   :  { %439 = vst.msk [vmem:[#allocation2 + $0x3] ss:$8 sm:$0xf] %vm1070_vm4, %v438_v61  ;;  %v476_v50 = vcombine.low %v464_v30, %v470_v45  ;;  %v483_v20 = vrot.slane %v475_v46, %v1010_v19  ;;  %v572_v31 = vrot.slane %v1105_v55, 4  ;;  %v578_v51 = vrot.slane %v1107_v56, 4 }
  0xb8   :  { %v518_v52 = vrot.slane %v517_v47, 1  ;;  %v523_v53 = vadd.f32 %v522_v42, %v521_v59  ;;  %v529_v54 = vadd.f32 %v528_v48, %v527_v44  ;;  %v534_v21 = vrot.slane %v533_v14, 2  ;;  %v571_v45 = vld [vmem:[#allocation2 + $0x7] ss:$8 sm:$0xf] }
  0xb9   :  { %v490_v34 = vrot.slane %v476_v50, %v1010_v19  ;;  %v573_v22 = vadd.f32 %v572_v31, %v1105_v55  ;;  %v579_v9 = vadd.f32 %v578_v51, %v1107_v56  ;;  %v584_v60 = vrot.slane %v1112_v2, 4 }
  0xba   :  { %v519_v62 = vadd.f32 %v518_v52, %v517_v47  ;;  %v524_v63 = vrot.slane %v523_v53, 1  ;;  %v530_v0 = vrot.slane %v529_v54, 1  ;;  %v535_v1 = vadd.f32 %v534_v21, %v533_v14 }
  0xbb   :  { %v491_v3 = vcombine.low %v483_v20, %v490_v34  ;;  %v574_v5 = vrot.slane %v573_v22, 2  ;;  %v580_v23 = vrot.slane %v579_v9, 2  ;;  %v585_v6 = vadd.f32 %v584_v60, %v1112_v2 }
  0xbc   :  { %v525_v7 = vadd.f32 %v524_v63, %v523_v53  ;;  %v531_v29 = vadd.f32 %v530_v0, %v529_v54  ;;  %v536_v24 = vrot.slane %v535_v1, 1  ;;  %v590_v8 = vrot.slane %v1114_v4, 4 }
  0xbd   :  { %v498_v55 = vrot.slane %v491_v3, %v1010_v19  ;;  %v575_v56 = vadd.f32 %v574_v5, %v573_v22  ;;  %v581_v10 = vadd.f32 %v580_v23, %v579_v9  ;;  %v586_v11 = vrot.slane %v585_v6, 2 }
  0xbe   :  { %v537_v32 = vadd.f32 %v536_v24, %v535_v1  ;;  %v542_v26 = vcombine.low %v519_v62, %v525_v7  ;;  %v591_v12 = vadd.f32 %v590_v8, %v1114_v4 }
  0xbf   :  { %v500_v27 = vadd.f32 %v498_v55, %v442_v25  ;;  %v576_v13 = vrot.slane %v575_v56, 1  ;;  %v582_v15 = vrot.slane %v581_v10, 1  ;;  %v587_v16 = vadd.f32 %v586_v11, %v585_v6 }
  0xc0   :  { %v543_v2 = vcombine.low %v531_v29, %v537_v32  ;;  %v550_v33 = vrot.slane %v542_v26, %v1010_v19  ;;  %v592_v18 = vrot.slane %v591_v12, 2 }
  0xc1   :  { %501 = vst.msk [vmem:[#allocation2 + $0x4] ss:$8 sm:$0xf] %vm1070_vm4, %v500_v27  ;;  %v577_v57 = vadd.f32 %v576_v13, %v575_v56  ;;  %v583_v28 = vadd.f32 %v582_v15, %v581_v10  ;;  %v588_v35 = vrot.slane %v587_v16, 1 }
  0xc2   :  { %v557_v58 = vrot.slane %v543_v2, %v1010_v19  ;;  %v593_v36 = vadd.f32 %v592_v18, %v591_v12 }
  0xc3   :  { %v589_v38 = vadd.f32 %v588_v35, %v587_v16  ;;  %v600_v39 = vcombine.low %v577_v57, %v583_v28 }
  0xc4   :  { %v558_v37 = vcombine.low %v550_v33, %v557_v58  ;;  %v594_v4 = vrot.slane %v593_v36, 1 }
  0xc5   :  { %v608_v17 = vrot.slane %v600_v39, %v1010_v19 }
  0xc6   :  { %v565_v41 = vrot.slane %v558_v37, %v1010_v19  ;;  %v595_v43 = vadd.f32 %v594_v4, %v593_v36 }
  0xc8   :  { %v567_v59 = vadd.f32 %v565_v41, %v509_v40  ;;  %v601_v44 = vcombine.low %v589_v38, %v595_v43 }
  0xca   :  { %568 = vst.msk [vmem:[#allocation2 + $0x6] ss:$8 sm:$0xf] %vm1070_vm4, %v567_v59  ;;  %v615_v61 = vrot.slane %v601_v44, %v1010_v19 }
  0xcc   :  { %v616_v30 = vcombine.low %v608_v17, %v615_v61 }
  0xce   :  { %v623_v46 = vrot.slane %v616_v30, %v1010_v19 }
  0xd0   :  { %v625_v47 = vadd.f32 %v623_v46, %v571_v45 }
  0xd2   :  { %626 = vst.msk [vmem:[#allocation2 + $0x7] ss:$8 sm:$0xf] %vm1070_vm4, %v625_v47 }
  0xd9   :  { %v631_v42 = vld [vmem:[#allocation2] sm:$0xff]  ;;  %v632_v48 = vld [vmem:[#allocation2 + $0x8] sm:$0xff]  ;;  %v633_v14 = vld [vmem:[#allocation2 + $0x10] sm:$0xff] }
  0xda   :  { %v635_v50 = vadd.f32 %v632_v48, %v631_v42  ;;  %v634_v20 = vld [vmem:[#allocation2 + $0x18] sm:$0xff] }
  0xdc   :  { %v636_v31 = vadd.f32 %v635_v50, %v633_v14 }
  0xde   :  { %v637_v51 = vadd.f32 %v636_v31, %v634_v20 }
  0xe0   :  { %638 = vadd.xlane.f32.xlu0 %v637_v51 }
  0xe1   :  { %847 = shalt.err (!%p844_p4)
}
  0xe2   :  { %s848_s10 = scalar_lea.hbm %s1178_s7, 512 }
  0xe3   :  { %p849_p5 = scmp.ne.s32.totalorder %s1178_s7, %s848_s10  ;;  %p852_p6 = scmp.lt.u32.totalorder %s848_s10, %s1178_s7 }
  0xe5   :  { %p854_p7 = pnand %p852_p6, %p849_p5 }
  0xe7   :  { %857 = shalt.err (!%p854_p7)
}
  0xe8   :  { %651 = dma.vmem_to_hbm [thread:$0]  %s649_s15, 512, %s1178_s7, [#allocation5]   ;;  %vm640_vm5 = vcmask 7168  }
 0x16d   :  { %v639_v19 = vpop.xlane.xlu0 %638 }
 0x16e   :  { %641 = vst.msk [vmem:[%s1179_s8] sm:$0xff] %vm640_vm5, %v639_v19 }
 0x16f   :  { %866 = dma.done.wait [#allocation5], 512  }
 0x170   :  { %867 = vsyncadd [#allocation5], 4294966784 }
 0x171   :  { %659 = vsyncpa [#allocation4], 1 }
 0x172   :  { %660 = vsyncpa [#allocation7], 1 }
 0x173   :  { %661 = vsyncpa [#allocation10], 1 }
 0x174   :  { %662 = vsyncpa [#allocation13], 1 }
 0x175   :  { %663 = vsyncpa [#allocation5], 1 }

</bundles_post_ra>
